<compile_context>
chip_gen: v7x
topology: tpu7x:2x2x1
jax: 0.10.0
libtpu: 0.0.40
codegen_flags: <defaults>
</compile_context>

<pallas_src>
import jax
import jax.numpy as jnp
from jax.experimental import pallas as pl
from jax.experimental.pallas import tpu as pltpu

N_INPUT = 44
HIDDEN_UNIT = 10
BN_EPS = 1e-5
LANE = 128          # lane-dense packed output width
ENC_OFF = 64        # latent packed into output lanes [ENC_OFF, ENC_OFF + HIDDEN_UNIT)
MAX_TILE_B = 1024   # max batch tile (per-step VMEM footprint stays in the low MiB)


def _round_up(x, m):
    return ((x + m - 1) // m) * m


def _cdiv(a, b):
    return -(-a // b)


# --------------------------------------------------------------------------
# Kernel: one batch tile -> full encoder + decoder chain -> one packed output.
# Weights are (in, out) bf16; biases are (1, out) f32; BatchNorms pre-folded.
# --------------------------------------------------------------------------
def _make_kernel(nsub, sub_rows):
    def kernel(
        x_ref,
        ew1, eb1, ew2, eb2, ew3, eb3, ew4, eb4,
        dw1, db1, dw2, db2, dw3, db3, dw4, db4,
        out_ref,
    ):
        f32 = jnp.float32
        cdt = ew1.dtype  # compute (MXU operand) dtype, bf16

        def dense_relu(h, w_ref, b_ref):
            y = jnp.dot(h, w_ref[...], preferred_element_type=f32) + b_ref[...]
            return jnp.maximum(y, 0.0).astype(cdt)

        # Static unroll over independent row sub-chunks: two chains let the
        # scheduler overlap the MXU of one with the VPU epilogue of the other.
        for sub in range(nsub):
            r0 = sub * sub_rows                       # static offset
            x = x_ref[pl.ds(r0, sub_rows), :]

            # ---------------- encoder ----------------
            h = dense_relu(x, ew1, eb1)               # (rows, 128); BN folded into ew2/eb2
            h = dense_relu(h, ew2, eb2)               # (rows, 64)
            h = dense_relu(h, ew3, eb3)               # (rows, 64); Dropout = identity (eval)
            enc = jnp.dot(h, ew4[...], preferred_element_type=f32) + eb4[...]
            # enc: (rows, 128), exactly zero outside lanes [ENC_OFF, ENC_OFF+10)

            # ---------------- decoder ----------------
            h = dense_relu(enc.astype(cdt), dw1, db1)  # dw1 rows pre-shifted to [ENC_OFF, ...)
            h = dense_relu(h, dw2, db2)                # (rows, 128); BN folded into dw3/db3
            h = dense_relu(h, dw3, db3)                # (rows, 128)
            dec = jnp.dot(h, dw4[...], preferred_element_type=f32) + db4[...]
            dec = jnp.maximum(dec, 0.0)                # exactly zero outside lanes [0, 44)

            # Pack latent + reconstruction into one lane-dense 128-wide bf16 slab.
            out_ref[pl.ds(r0, sub_rows), :] = (dec + enc).astype(out_ref.dtype)

    return kernel


# --------------------------------------------------------------------------
# Wrapper
# --------------------------------------------------------------------------
def simple_autoencoder_forward(x, kernel_params, return_packed=False):
    """x: (B, N_INPUT) float32. kernel_params: output of prepare_params().

    Returns (encoded (B,10), decoded (B,44)) in f32, or, with
    return_packed=True, the raw (B_pad, 128) bf16 packed buffer
    (reconstruction in lanes [0,44), latent in lanes [64,74))."""
    B = x.shape[0]

    # Balanced, low-padding tiling; even grid count when >1 step so both v7x
    # TensorCores get work under dimension_semantics=("parallel",).
    steps = max(1, _cdiv(B, MAX_TILE_B))
    if B > 16:
        steps = _round_up(steps, 2)
    tile_b = _round_up(_cdiv(B, steps), 16)   # bf16 packs 16 rows per sublane group
    B_pad = steps * tile_b
    nsub = 2 if (tile_b % 32 == 0 and tile_b >= 128) else 1
    sub_rows = tile_b // nsub

    xp = x.astype(kernel_params[0].dtype)          # bf16 operand stream
    if B_pad != B:
        xp = jnp.pad(xp, ((0, B_pad - B), (0, 0)))

    def param_spec(p):
        # full array, constant block index -> stays VMEM-resident across the grid
        return pl.BlockSpec(p.shape, lambda i: (0, 0))

    in_specs = [pl.BlockSpec((tile_b, N_INPUT), lambda i: (i, 0))]
    in_specs += [param_spec(p) for p in kernel_params]

    out_spec = pl.BlockSpec((tile_b, LANE), lambda i: (i, 0))
    out_shape = jax.ShapeDtypeStruct((B_pad, LANE), jnp.bfloat16)

    flops = 2 * B_pad * (
        N_INPUT * 128 + 128 * 64 + 64 * 64 + 64 * LANE      # encoder
        + LANE * 64 + 64 * 128 + 128 * 128 + 128 * LANE     # decoder
    )
    bytes_accessed = (
        xp.size * xp.dtype.itemsize
        + B_pad * LANE * 2                                   # packed bf16 output
        + sum(int(p.size) * p.dtype.itemsize for p in kernel_params)
    )
    cost = pl.CostEstimate(flops=flops, transcendentals=0,
                           bytes_accessed=bytes_accessed)

    packed = pl.pallas_call(
        _make_kernel(nsub, sub_rows),
        out_shape=out_shape,
        grid=(steps,),
        in_specs=in_specs,
        out_specs=out_spec,
        compiler_params=pltpu.CompilerParams(
            dimension_semantics=("parallel",)),
        cost_estimate=cost,
    )(xp, *kernel_params)

    if return_packed:
        # Consumers that can index the packed buffer directly avoid a second
        # HBM pass over the (dominant) output stream.
        return packed

    enc = packed[:B, ENC_OFF:ENC_OFF + HIDDEN_UNIT].astype(jnp.float32)
    dec = packed[:B, :N_INPUT].astype(jnp.float32)
    return enc, dec


# --------------------------------------------------------------------------
# Parameter construction / preparation
# --------------------------------------------------------------------------
def init_params(key):
    """Deterministic init mimicking nn.Linear shapes. Weights stored as (in, out)."""

    def linear(key, fan_in, fan_out):
        kw, kb = jax.random.split(key)
        bound = 1.0 / jnp.sqrt(jnp.float32(fan_in))
        w = jax.random.uniform(kw, (fan_in, fan_out), jnp.float32, -bound, bound)
        b = jax.random.uniform(kb, (1, fan_out), jnp.float32, -bound, bound)
        return w, b

    keys = jax.random.split(key, 8)
    ew1, eb1 = linear(keys[0], N_INPUT, 128)
    ew2, eb2 = linear(keys[1], 128, 64)
    ew3, eb3 = linear(keys[2], 64, 64)
    ew4, eb4 = linear(keys[3], 64, HIDDEN_UNIT)
    ebn_g = jnp.ones((1, 128), jnp.float32)
    ebn_b = jnp.zeros((1, 128), jnp.float32)
    ebn_m = jnp.zeros((1, 128), jnp.float32)
    ebn_v = jnp.ones((1, 128), jnp.float32)
    dw1, db1 = linear(keys[4], HIDDEN_UNIT, 64)
    dw2, db2 = linear(keys[5], 64, 128)
    dw3, db3 = linear(keys[6], 128, 128)
    dw4, db4 = linear(keys[7], 128, N_INPUT)
    dbn_g = jnp.ones((1, 128), jnp.float32)
    dbn_b = jnp.zeros((1, 128), jnp.float32)
    dbn_m = jnp.zeros((1, 128), jnp.float32)
    dbn_v = jnp.ones((1, 128), jnp.float32)

    return [
        ew1, eb1, ebn_g, ebn_b, ebn_m, ebn_v,
        ew2, eb2, ew3, eb3, ew4, eb4,
        dw1, db1, dw2, db2, dbn_g, dbn_b, dbn_m, dbn_v,
        dw3, db3, dw4, db4,
    ]


def prepare_params(params, compute_dtype=jnp.bfloat16):
    """Fold eval-mode BatchNorms into the following Linear, zero-pad the latent
    (10 -> lanes [64,74)) and reconstruction (44 -> lanes [0,44)) dims so the
    kernel can pack both into one lane-dense 128-wide output, cast weights to
    the bf16 operand dtype (biases stay f32)."""
    (ew1, eb1, ebn_g, ebn_b, ebn_m, ebn_v,
     ew2, eb2, ew3, eb3, ew4, eb4,
     dw1, db1, dw2, db2, dbn_g, dbn_b, dbn_m, dbn_v,
     dw3, db3, dw4, db4) = params

    def fold_bn(g, b, m, v, w, bias):
        scale = g / jnp.sqrt(v + BN_EPS)       # (1, C)
        shift = b - m * scale                  # (1, C)
        w_f = scale.reshape(-1, 1) * w         # (C, out)
        b_f = bias + shift @ w                 # (1, out)
        return w_f, b_f

    ew2_f, eb2_f = fold_bn(ebn_g, ebn_b, ebn_m, ebn_v, ew2, eb2)
    dw3_f, db3_f = fold_bn(dbn_g, dbn_b, dbn_m, dbn_v, dw3, db3)

    # lane-dense zero padding; latent columns pre-shifted to [ENC_OFF, ENC_OFF+10)
    enc_pad = (ENC_OFF, LANE - ENC_OFF - HIDDEN_UNIT)
    ew4_p = jnp.pad(ew4, ((0, 0), enc_pad))
    eb4_p = jnp.pad(eb4, ((0, 0), enc_pad))
    dw1_p = jnp.pad(dw1, (enc_pad, (0, 0)))
    dw4_p = jnp.pad(dw4, ((0, 0), (0, LANE - N_INPUT)))
    db4_p = jnp.pad(db4, ((0, 0), (0, LANE - N_INPUT)))

    weights = [ew1, ew2_f, ew3, ew4_p, dw1_p, dw2, dw3_f, dw4_p]
    biases = [eb1, eb2_f, eb3, eb4_p, db1, db2, db3_f, db4_p]
    weights = [w.astype(compute_dtype) for w in weights]
    biases = [b.astype(jnp.float32) for b in biases]

    (ew1c, ew2c, ew3c, ew4c, dw1c, dw2c, dw3c, dw4c) = weights
    (eb1c, eb2c, eb3c, eb4c, db1c, db2c, db3c, db4c) = biases
    return [ew1c, eb1c, ew2c, eb2c, ew3c, eb3c, ew4c, eb4c,
            dw1c, db1c, dw2c, db2c, dw3c, db3c, dw4c, db4c]


def reference_forward(x, params):
    """Pure-JAX f32 reference (mirrors the PyTorch eval-mode forward)."""
    (ew1, eb1, ebn_g, ebn_b, ebn_m, ebn_v,
     ew2, eb2, ew3, eb3, ew4, eb4,
     dw1, db1, dw2, db2, dbn_g, dbn_b, dbn_m, dbn_v,
     dw3, db3, dw4, db4) = params
    relu = lambda v: jnp.maximum(v, 0.0)
    h = relu(x @ ew1 + eb1)
    h = (h - ebn_m) / jnp.sqrt(ebn_v + BN_EPS) * ebn_g + ebn_b
    h = relu(h @ ew2 + eb2)
    h = relu(h @ ew3 + eb3)
    enc = h @ ew4 + eb4
    h = relu(enc @ dw1 + db1)
    h = relu(h @ dw2 + db2)
    h = (h - dbn_m) / jnp.sqrt(dbn_v + BN_EPS) * dbn_g + dbn_b
    h = relu(h @ dw3 + db3)
    dec = relu(h @ dw4 + db4)
    return enc, dec


if __name__ == "__main__":
    key = jax.random.PRNGKey(0)
    kx, kp = jax.random.split(key)
    params = init_params(kp)
    kernel_params = prepare_params(params)

    # small batch (single grid step) and a larger batch exercising the
    # multi-step balanced grid + batch padding + sub-chunk paths
    for B in (8, 2050):
        xb = jax.random.normal(jax.random.fold_in(kx, B), (B, N_INPUT), jnp.float32)

        enc, dec = simple_autoencoder_forward(xb, kernel_params)
        enc, dec = jax.block_until_ready((enc, dec))

        enc_ref, dec_ref = reference_forward(xb, params)
        assert enc.shape == (B, HIDDEN_UNIT) and dec.shape == (B, N_INPUT)
        # bf16 operands + bf16 packed output, f32 accumulation -> relaxed tolerance
        assert jnp.allclose(enc, enc_ref, atol=5e-2, rtol=5e-2), "encoder mismatch"
        assert jnp.allclose(dec, dec_ref, atol=5e-2, rtol=5e-2), "decoder mismatch"

    print("KERNEL_OK")
</pallas_src>

<mosaic_0001>
module attributes {stable_mosaic.version = 11 : i64} {
  func.func @kernel(%arg0: i32, %arg1: memref<16x44xbf16, #tpu.memory_space<vmem>>, %arg2: memref<44x128xbf16, #tpu.memory_space<vmem>>, %arg3: memref<1x128xf32, #tpu.memory_space<vmem>>, %arg4: memref<128x64xbf16, #tpu.memory_space<vmem>>, %arg5: memref<1x64xf32, #tpu.memory_space<vmem>>, %arg6: memref<64x64xbf16, #tpu.memory_space<vmem>>, %arg7: memref<1x64xf32, #tpu.memory_space<vmem>>, %arg8: memref<64x128xbf16, #tpu.memory_space<vmem>>, %arg9: memref<1x128xf32, #tpu.memory_space<vmem>>, %arg10: memref<128x64xbf16, #tpu.memory_space<vmem>>, %arg11: memref<1x64xf32, #tpu.memory_space<vmem>>, %arg12: memref<64x128xbf16, #tpu.memory_space<vmem>>, %arg13: memref<1x128xf32, #tpu.memory_space<vmem>>, %arg14: memref<128x128xbf16, #tpu.memory_space<vmem>>, %arg15: memref<1x128xf32, #tpu.memory_space<vmem>>, %arg16: memref<128x128xbf16, #tpu.memory_space<vmem>>, %arg17: memref<1x128xf32, #tpu.memory_space<vmem>>, %arg18: memref<16x128xbf16, #tpu.memory_space<vmem>>) attributes {dimension_semantics = [#tpu.dimension_semantics<parallel>], iteration_bounds = array<i64: 1>, scalar_prefetch = 0 : i64, scratch_operands = 0 : i64, tpu.core_type = #tpu.core_type<tc>, window_params = [{transform_indices = @transform_0, window_bounds = array<i64: 16, 44>}, {pipeline_mode = #tpu.pipeline_mode<synchronous>, transform_indices = @transform_1, window_bounds = array<i64: 44, 128>}, {pipeline_mode = #tpu.pipeline_mode<synchronous>, transform_indices = @transform_2, window_bounds = array<i64: 1, 128>}, {pipeline_mode = #tpu.pipeline_mode<synchronous>, transform_indices = @transform_3, window_bounds = array<i64: 128, 64>}, {pipeline_mode = #tpu.pipeline_mode<synchronous>, transform_indices = @transform_4, window_bounds = array<i64: 1, 64>}, {pipeline_mode = #tpu.pipeline_mode<synchronous>, transform_indices = @transform_5, window_bounds = array<i64: 64, 64>}, {pipeline_mode = #tpu.pipeline_mode<synchronous>, transform_indices = @transform_6, window_bounds = array<i64: 1, 64>}, {pipeline_mode = #tpu.pipeline_mode<synchronous>, transform_indices = @transform_7, window_bounds = array<i64: 64, 128>}, {pipeline_mode = #tpu.pipeline_mode<synchronous>, transform_indices = @transform_8, window_bounds = array<i64: 1, 128>}, {pipeline_mode = #tpu.pipeline_mode<synchronous>, transform_indices = @transform_9, window_bounds = array<i64: 128, 64>}, {pipeline_mode = #tpu.pipeline_mode<synchronous>, transform_indices = @transform_10, window_bounds = array<i64: 1, 64>}, {pipeline_mode = #tpu.pipeline_mode<synchronous>, transform_indices = @transform_11, window_bounds = array<i64: 64, 128>}, {pipeline_mode = #tpu.pipeline_mode<synchronous>, transform_indices = @transform_12, window_bounds = array<i64: 1, 128>}, {pipeline_mode = #tpu.pipeline_mode<synchronous>, transform_indices = @transform_13, window_bounds = array<i64: 128, 128>}, {pipeline_mode = #tpu.pipeline_mode<synchronous>, transform_indices = @transform_14, window_bounds = array<i64: 1, 128>}, {pipeline_mode = #tpu.pipeline_mode<synchronous>, transform_indices = @transform_15, window_bounds = array<i64: 128, 128>}, {pipeline_mode = #tpu.pipeline_mode<synchronous>, transform_indices = @transform_16, window_bounds = array<i64: 1, 128>}, {transform_indices = @transform_17, window_bounds = array<i64: 16, 128>}]} {
    %c0 = arith.constant 0 : index
    %c0_0 = arith.constant 0 : index
    %0 = vector.load %arg1[%c0, %c0_0] : memref<16x44xbf16, #tpu.memory_space<vmem>>, vector<16x44xbf16>
    %c0_1 = arith.constant 0 : index
    %c0_2 = arith.constant 0 : index
    %1 = vector.load %arg2[%c0_1, %c0_2] : memref<44x128xbf16, #tpu.memory_space<vmem>>, vector<44x128xbf16>
    %cst = arith.constant dense<0.000000e+00> : vector<16x128xf32>
    %2 = tpu.matmul %0, %1, %cst {dimension_numbers = #tpu.dot_dimension_numbers<[1], [0], [0], [1], [0, 0, 1, 1], [], []>} : vector<16x44xbf16>, vector<44x128xbf16>, vector<16x128xf32> -> vector<16x128xf32>
    %c0_3 = arith.constant 0 : index
    %c0_4 = arith.constant 0 : index
    %3 = vector.load %arg3[%c0_3, %c0_4] : memref<1x128xf32, #tpu.memory_space<vmem>>, vector<1x128xf32>
    %4 = vector.broadcast %3 : vector<1x128xf32> to vector<16x128xf32>
    %5 = arith.addf %2, %4 : vector<16x128xf32>
    %cst_5 = arith.constant 0.000000e+00 : f32
    %6 = vector.broadcast %cst_5 : f32 to vector<16x128xf32>
    %7 = arith.maximumf %5, %6 : vector<16x128xf32>
    %8 = arith.truncf %7 : vector<16x128xf32> to vector<16x128xbf16>
    %c0_6 = arith.constant 0 : index
    %c0_7 = arith.constant 0 : index
    %9 = vector.load %arg4[%c0_6, %c0_7] : memref<128x64xbf16, #tpu.memory_space<vmem>>, vector<128x64xbf16>
    %cst_8 = arith.constant dense<0.000000e+00> : vector<16x64xf32>
    %10 = tpu.matmul %8, %9, %cst_8 {dimension_numbers = #tpu.dot_dimension_numbers<[1], [0], [0], [1], [0, 0, 1, 1], [], []>} : vector<16x128xbf16>, vector<128x64xbf16>, vector<16x64xf32> -> vector<16x64xf32>
    %c0_9 = arith.constant 0 : index
    %c0_10 = arith.constant 0 : index
    %11 = vector.load %arg5[%c0_9, %c0_10] : memref<1x64xf32, #tpu.memory_space<vmem>>, vector<1x64xf32>
    %12 = vector.broadcast %11 : vector<1x64xf32> to vector<16x64xf32>
    %13 = arith.addf %10, %12 : vector<16x64xf32>
    %cst_11 = arith.constant 0.000000e+00 : f32
    %14 = vector.broadcast %cst_11 : f32 to vector<16x64xf32>
    %15 = arith.maximumf %13, %14 : vector<16x64xf32>
    %16 = arith.truncf %15 : vector<16x64xf32> to vector<16x64xbf16>
    %c0_12 = arith.constant 0 : index
    %c0_13 = arith.constant 0 : index
    %17 = vector.load %arg6[%c0_12, %c0_13] : memref<64x64xbf16, #tpu.memory_space<vmem>>, vector<64x64xbf16>
    %cst_14 = arith.constant dense<0.000000e+00> : vector<16x64xf32>
    %18 = tpu.matmul %16, %17, %cst_14 {dimension_numbers = #tpu.dot_dimension_numbers<[1], [0], [0], [1], [0, 0, 1, 1], [], []>} : vector<16x64xbf16>, vector<64x64xbf16>, vector<16x64xf32> -> vector<16x64xf32>
    %c0_15 = arith.constant 0 : index
    %c0_16 = arith.constant 0 : index
    %19 = vector.load %arg7[%c0_15, %c0_16] : memref<1x64xf32, #tpu.memory_space<vmem>>, vector<1x64xf32>
    %20 = vector.broadcast %19 : vector<1x64xf32> to vector<16x64xf32>
    %21 = arith.addf %18, %20 : vector<16x64xf32>
    %cst_17 = arith.constant 0.000000e+00 : f32
    %22 = vector.broadcast %cst_17 : f32 to vector<16x64xf32>
    %23 = arith.maximumf %21, %22 : vector<16x64xf32>
    %24 = arith.truncf %23 : vector<16x64xf32> to vector<16x64xbf16>
    %c0_18 = arith.constant 0 : index
    %c0_19 = arith.constant 0 : index
    %25 = vector.load %arg8[%c0_18, %c0_19] : memref<64x128xbf16, #tpu.memory_space<vmem>>, vector<64x128xbf16>
    %cst_20 = arith.constant dense<0.000000e+00> : vector<16x128xf32>
    %26 = tpu.matmul %24, %25, %cst_20 {dimension_numbers = #tpu.dot_dimension_numbers<[1], [0], [0], [1], [0, 0, 1, 1], [], []>} : vector<16x64xbf16>, vector<64x128xbf16>, vector<16x128xf32> -> vector<16x128xf32>
    %c0_21 = arith.constant 0 : index
    %c0_22 = arith.constant 0 : index
    %27 = vector.load %arg9[%c0_21, %c0_22] : memref<1x128xf32, #tpu.memory_space<vmem>>, vector<1x128xf32>
    %28 = vector.broadcast %27 : vector<1x128xf32> to vector<16x128xf32>
    %29 = arith.addf %26, %28 : vector<16x128xf32>
    %30 = arith.truncf %29 : vector<16x128xf32> to vector<16x128xbf16>
    %c0_23 = arith.constant 0 : index
    %c0_24 = arith.constant 0 : index
    %31 = vector.load %arg10[%c0_23, %c0_24] : memref<128x64xbf16, #tpu.memory_space<vmem>>, vector<128x64xbf16>
    %cst_25 = arith.constant dense<0.000000e+00> : vector<16x64xf32>
    %32 = tpu.matmul %30, %31, %cst_25 {dimension_numbers = #tpu.dot_dimension_numbers<[1], [0], [0], [1], [0, 0, 1, 1], [], []>} : vector<16x128xbf16>, vector<128x64xbf16>, vector<16x64xf32> -> vector<16x64xf32>
    %c0_26 = arith.constant 0 : index
    %c0_27 = arith.constant 0 : index
    %33 = vector.load %arg11[%c0_26, %c0_27] : memref<1x64xf32, #tpu.memory_space<vmem>>, vector<1x64xf32>
    %34 = vector.broadcast %33 : vector<1x64xf32> to vector<16x64xf32>
    %35 = arith.addf %32, %34 : vector<16x64xf32>
    %cst_28 = arith.constant 0.000000e+00 : f32
    %36 = vector.broadcast %cst_28 : f32 to vector<16x64xf32>
    %37 = arith.maximumf %35, %36 : vector<16x64xf32>
    %38 = arith.truncf %37 : vector<16x64xf32> to vector<16x64xbf16>
    %c0_29 = arith.constant 0 : index
    %c0_30 = arith.constant 0 : index
    %39 = vector.load %arg12[%c0_29, %c0_30] : memref<64x128xbf16, #tpu.memory_space<vmem>>, vector<64x128xbf16>
    %cst_31 = arith.constant dense<0.000000e+00> : vector<16x128xf32>
    %40 = tpu.matmul %38, %39, %cst_31 {dimension_numbers = #tpu.dot_dimension_numbers<[1], [0], [0], [1], [0, 0, 1, 1], [], []>} : vector<16x64xbf16>, vector<64x128xbf16>, vector<16x128xf32> -> vector<16x128xf32>
    %c0_32 = arith.constant 0 : index
    %c0_33 = arith.constant 0 : index
    %41 = vector.load %arg13[%c0_32, %c0_33] : memref<1x128xf32, #tpu.memory_space<vmem>>, vector<1x128xf32>
    %42 = vector.broadcast %41 : vector<1x128xf32> to vector<16x128xf32>
    %43 = arith.addf %40, %42 : vector<16x128xf32>
    %cst_34 = arith.constant 0.000000e+00 : f32
    %44 = vector.broadcast %cst_34 : f32 to vector<16x128xf32>
    %45 = arith.maximumf %43, %44 : vector<16x128xf32>
    %46 = arith.truncf %45 : vector<16x128xf32> to vector<16x128xbf16>
    %c0_35 = arith.constant 0 : index
    %c0_36 = arith.constant 0 : index
    %47 = vector.load %arg14[%c0_35, %c0_36] : memref<128x128xbf16, #tpu.memory_space<vmem>>, vector<128x128xbf16>
    %cst_37 = arith.constant dense<0.000000e+00> : vector<16x128xf32>
    %48 = tpu.matmul %46, %47, %cst_37 {dimension_numbers = #tpu.dot_dimension_numbers<[1], [0], [0], [1], [0, 0, 1, 1], [], []>} : vector<16x128xbf16>, vector<128x128xbf16>, vector<16x128xf32> -> vector<16x128xf32>
    %c0_38 = arith.constant 0 : index
    %c0_39 = arith.constant 0 : index
    %49 = vector.load %arg15[%c0_38, %c0_39] : memref<1x128xf32, #tpu.memory_space<vmem>>, vector<1x128xf32>
    %50 = vector.broadcast %49 : vector<1x128xf32> to vector<16x128xf32>
    %51 = arith.addf %48, %50 : vector<16x128xf32>
    %cst_40 = arith.constant 0.000000e+00 : f32
    %52 = vector.broadcast %cst_40 : f32 to vector<16x128xf32>
    %53 = arith.maximumf %51, %52 : vector<16x128xf32>
    %54 = arith.truncf %53 : vector<16x128xf32> to vector<16x128xbf16>
    %c0_41 = arith.constant 0 : index
    %c0_42 = arith.constant 0 : index
    %55 = vector.load %arg16[%c0_41, %c0_42] : memref<128x128xbf16, #tpu.memory_space<vmem>>, vector<128x128xbf16>
    %cst_43 = arith.constant dense<0.000000e+00> : vector<16x128xf32>
    %56 = tpu.matmul %54, %55, %cst_43 {dimension_numbers = #tpu.dot_dimension_numbers<[1], [0], [0], [1], [0, 0, 1, 1], [], []>} : vector<16x128xbf16>, vector<128x128xbf16>, vector<16x128xf32> -> vector<16x128xf32>
    %c0_44 = arith.constant 0 : index
    %c0_45 = arith.constant 0 : index
    %57 = vector.load %arg17[%c0_44, %c0_45] : memref<1x128xf32, #tpu.memory_space<vmem>>, vector<1x128xf32>
    %58 = vector.broadcast %57 : vector<1x128xf32> to vector<16x128xf32>
    %59 = arith.addf %56, %58 : vector<16x128xf32>
    %cst_46 = arith.constant 0.000000e+00 : f32
    %60 = vector.broadcast %cst_46 : f32 to vector<16x128xf32>
    %61 = arith.maximumf %59, %60 : vector<16x128xf32>
    %62 = arith.addf %61, %29 : vector<16x128xf32>
    %63 = arith.truncf %62 : vector<16x128xf32> to vector<16x128xbf16>
    %c0_47 = arith.constant 0 : index
    %c0_48 = arith.constant 0 : index
    %64 = vector.load %arg18[%c0_47, %c0_48] : memref<16x128xbf16, #tpu.memory_space<vmem>>, vector<16x128xbf16>
    tpu.vector_store %arg18[%c0_47, %c0_48], %63 {strides = array<i32>} : memref<16x128xbf16, #tpu.memory_space<vmem>>, vector<16x128xbf16>,
    return
  }
  func.func @transform_0(%arg0: i32) -> (i32, i32) {
    %c0_i32 = arith.constant 0 : i32
    %c0_i32_0 = arith.constant 0 : i32
    return %arg0, %c0_i32 : i32, i32
  }
  func.func @transform_1(%arg0: i32) -> (i32, i32) {
    %c0_i32 = arith.constant 0 : i32
    %c0_i32_0 = arith.constant 0 : i32
    %c0_i32_1 = arith.constant 0 : i32
    return %c0_i32, %c0_i32_0 : i32, i32
  }
  func.func @transform_2(%arg0: i32) -> (i32, i32) {
    %c0_i32 = arith.constant 0 : i32
    %c0_i32_0 = arith.constant 0 : i32
    %c0_i32_1 = arith.constant 0 : i32
    return %c0_i32, %c0_i32_0 : i32, i32
  }
  func.func @transform_3(%arg0: i32) -> (i32, i32) {
    %c0_i32 = arith.constant 0 : i32
    %c0_i32_0 = arith.constant 0 : i32
    %c0_i32_1 = arith.constant 0 : i32
    return %c0_i32, %c0_i32_0 : i32, i32
  }
  func.func @transform_4(%arg0: i32) -> (i32, i32) {
    %c0_i32 = arith.constant 0 : i32
    %c0_i32_0 = arith.constant 0 : i32
    %c0_i32_1 = arith.constant 0 : i32
    return %c0_i32, %c0_i32_0 : i32, i32
  }
  func.func @transform_5(%arg0: i32) -> (i32, i32) {
    %c0_i32 = arith.constant 0 : i32
    %c0_i32_0 = arith.constant 0 : i32
    %c0_i32_1 = arith.constant 0 : i32
    return %c0_i32, %c0_i32_0 : i32, i32
  }
  func.func @transform_6(%arg0: i32) -> (i32, i32) {
    %c0_i32 = arith.constant 0 : i32
    %c0_i32_0 = arith.constant 0 : i32
    %c0_i32_1 = arith.constant 0 : i32
    return %c0_i32, %c0_i32_0 : i32, i32
  }
  func.func @transform_7(%arg0: i32) -> (i32, i32) {
    %c0_i32 = arith.constant 0 : i32
    %c0_i32_0 = arith.constant 0 : i32
    %c0_i32_1 = arith.constant 0 : i32
    return %c0_i32, %c0_i32_0 : i32, i32
  }
  func.func @transform_8(%arg0: i32) -> (i32, i32) {
    %c0_i32 = arith.constant 0 : i32
    %c0_i32_0 = arith.constant 0 : i32
    %c0_i32_1 = arith.constant 0 : i32
    return %c0_i32, %c0_i32_0 : i32, i32
  }
  func.func @transform_9(%arg0: i32) -> (i32, i32) {
    %c0_i32 = arith.constant 0 : i32
    %c0_i32_0 = arith.constant 0 : i32
    %c0_i32_1 = arith.constant 0 : i32
    return %c0_i32, %c0_i32_0 : i32, i32
  }
  func.func @transform_10(%arg0: i32) -> (i32, i32) {
    %c0_i32 = arith.constant 0 : i32
    %c0_i32_0 = arith.constant 0 : i32
    %c0_i32_1 = arith.constant 0 : i32
    return %c0_i32, %c0_i32_0 : i32, i32
  }
  func.func @transform_11(%arg0: i32) -> (i32, i32) {
    %c0_i32 = arith.constant 0 : i32
    %c0_i32_0 = arith.constant 0 : i32
    %c0_i32_1 = arith.constant 0 : i32
    return %c0_i32, %c0_i32_0 : i32, i32
  }
  func.func @transform_12(%arg0: i32) -> (i32, i32) {
    %c0_i32 = arith.constant 0 : i32
    %c0_i32_0 = arith.constant 0 : i32
    %c0_i32_1 = arith.constant 0 : i32
    return %c0_i32, %c0_i32_0 : i32, i32
  }
  func.func @transform_13(%arg0: i32) -> (i32, i32) {
    %c0_i32 = arith.constant 0 : i32
    %c0_i32_0 = arith.constant 0 : i32
    %c0_i32_1 = arith.constant 0 : i32
    return %c0_i32, %c0_i32_0 : i32, i32
  }
  func.func @transform_14(%arg0: i32) -> (i32, i32) {
    %c0_i32 = arith.constant 0 : i32
    %c0_i32_0 = arith.constant 0 : i32
    %c0_i32_1 = arith.constant 0 : i32
    return %c0_i32, %c0_i32_0 : i32, i32
  }
  func.func @transform_15(%arg0: i32) -> (i32, i32) {
    %c0_i32 = arith.constant 0 : i32
    %c0_i32_0 = arith.constant 0 : i32
    %c0_i32_1 = arith.constant 0 : i32
    return %c0_i32, %c0_i32_0 : i32, i32
  }
  func.func @transform_16(%arg0: i32) -> (i32, i32) {
    %c0_i32 = arith.constant 0 : i32
    %c0_i32_0 = arith.constant 0 : i32
    %c0_i32_1 = arith.constant 0 : i32
    return %c0_i32, %c0_i32_0 : i32, i32
  }
  func.func @transform_17(%arg0: i32) -> (i32, i32) {
    %c0_i32 = arith.constant 0 : i32
    %c0_i32_0 = arith.constant 0 : i32
    return %arg0, %c0_i32 : i32, i32
  }
}

</mosaic_0001>

<bundles_post_ra>
// kernel: tpu_custom_call.1
= control target key start
LH: loop header
LB: loop body
LE: loop exit
PB: predicated region body
PF: predicated region fallthrough
CT: control target
= control target key end

     0   :  { %s1809_s0 = inlined_call_operand.hbm [shape: bf16[16,44], index: 0, kind: input, shape index: {}]   ;;  %s1810_s1 = inlined_call_operand.hbm [shape: bf16[44,128], index: 1, kind: input, shape index: {}]   ;;  %s1811_s2 = inlined_call_operand.vmem [shape: f32[1,128], index: 2, kind: input, shape index: {}]   ;;  %s1812_s3 = inlined_call_operand.vmem [shape: bf16[128,64], index: 3, kind: input, shape index: {}]   ;;  %s1813_s4 = inlined_call_operand.vmem [shape: f32[1,64], index: 4, kind: input, shape index: {}]   ;;  %s1814_s5 = inlined_call_operand.vmem [shape: bf16[64,64], index: 5, kind: input, shape index: {}]   ;;  %s1815_s6 = inlined_call_operand.hbm [shape: f32[1,64], index: 6, kind: input, shape index: {}]   ;;  %s1816_s7 = inlined_call_operand.hbm [shape: bf16[64,128], index: 7, kind: input, shape index: {}]   ;;  %s1817_s8 = inlined_call_operand.hbm [shape: f32[1,128], index: 8, kind: input, shape index: {}]   ;;  %s1818_s9 = inlined_call_operand.vmem [shape: bf16[128,64], index: 9, kind: input, shape index: {}]   ;;  %s1819_s10 = inlined_call_operand.vmem [shape: f32[1,64], index: 10, kind: input, shape index: {}]   ;;  %s1820_s11 = inlined_call_operand.vmem [shape: bf16[64,128], index: 11, kind: input, shape index: {}]   ;;  %s1821_s12 = inlined_call_operand.vmem [shape: f32[1,128], index: 12, kind: input, shape index: {}]   ;;  %s1822_s13 = inlined_call_operand.vmem [shape: bf16[128,128], index: 13, kind: input, shape index: {}]   ;;  %s1823_s14 = inlined_call_operand.vmem [shape: f32[1,128], index: 14, kind: input, shape index: {}]   ;;  %s1824_s15 = inlined_call_operand.vmem [shape: bf16[128,128], index: 15, kind: input, shape index: {}]   ;;  %s1825_s16 = inlined_call_operand.vmem [shape: f32[1,128], index: 16, kind: input, shape index: {}]   ;;  %s1826_s17 = inlined_call_operand.hbm [shape: bf16[16,128], index: 17, kind: output, shape index: {}]  }
   0x1   :  { %1830 = sst [smem:[#allocation16_spill]] %s1809_s0 }
   0x2   :  { %1831 = sst [smem:[#allocation17_spill]] %s1810_s1 }
   0x3   :  { %1832 = sst [smem:[#allocation18_spill]] %s1825_s16 }
   0x4   :  { %1833 = sst [smem:[#allocation19_spill]] %s1826_s17 }
   0x5   :  { %22 = vsyncpa [#allocation3], 0 }
   0x6   :  { %23 = vsyncpa [#allocation6], 0 }
   0x7   :  { %24 = vsyncpa [#allocation9], 0 }
   0x8   :  { %25 = vsyncpa [#allocation4], 0  ;;  %s1406_s24 = smov [#allocation5]   ;;  %s1407_s26 = smov [#allocation8]  }
   0x9   :  { %s43_s25 = sshll.u32 %s1406_s24, 4  ;;  %s73_s27 = sshll.u32 %s1407_s26, 4  ;;  %s44_s25 = int_to_ptr.vmem [resolvable:$true] %s43_s25  ;;  %s1506_s27 = int_to_ptr.vmem [resolvable:$true] %s73_s27 }
   0xa   :  { %s1834_s0 = sld [smem:[#allocation17_spill]] }
  0x10   :  { %s1266_s30 = scalar_lea.hbm %s1834_s0, 384 }
  0x11   :  { %p1267_p0 = scmp.ne.s32.totalorder %s1834_s0, %s1266_s30  ;;  %p1270_p1 = scmp.lt.u32.totalorder %s1266_s30, %s1834_s0 }
  0x13   :  { %p1272_p2 = pnand %p1270_p1, %p1267_p0 }
  0x15   :  { %1275 = shalt.err (!%p1272_p2)
}
  0x16   :  { %s1276_s21 = scalar_lea.vmem %s44_s25, 384  ;;  %p1281_p4 = scmp.lt.s32.totalorder %s44_s25, %s44_s25 }
  0x17   :  { %p1277_p3 = scmp.ne.s32.totalorder %s44_s25, %s1276_s21  ;;  %p1282_p5 = scmp.lt.s32.totalorder %s1276_s21, %s1276_s21 }
  0x19   :  { %p1283_p6 = por %p1282_p5, %p1281_p4 }
  0x1b   :  { %p1284_p7 = pnand %p1283_p6, %p1277_p3 }
  0x1d   :  { %1287 = shalt.err (!%p1284_p7)
}
  0x1e   :  { %s1408_s22 = smov 64   ;;  %s1409_s23 = smov 4  }
  0x1f   :  { %49 = dma.hbm_to_vmem [thread:$0]  %s1834_s0, 384, %s44_s25, [#allocation6], %s1408_s22, %s1408_s22, %s1409_s23  }
  0x20   :  { %s1288_s30 = scalar_lea.hbm %s1816_s7, 512 }
  0x21   :  { %p1289_p8 = scmp.ne.s32.totalorder %s1816_s7, %s1288_s30  ;;  %p1292_p9 = scmp.lt.u32.totalorder %s1288_s30, %s1816_s7 }
  0x23   :  { %p1294_p10 = pnand %p1292_p9, %p1289_p8 }
  0x25   :  { %1297 = shalt.err (!%p1294_p10)
}
  0x26   :  { %s1298_s21 = scalar_lea.vmem %s1506_s27, 512  ;;  %p1303_p12 = scmp.lt.s32.totalorder %s1506_s27, %s1506_s27 }
  0x27   :  { %p1299_p11 = scmp.ne.s32.totalorder %s1506_s27, %s1298_s21  ;;  %p1304_p13 = scmp.lt.s32.totalorder %s1298_s21, %s1298_s21 }
  0x29   :  { %p1305_p0 = por %p1304_p13, %p1303_p12 }
  0x2b   :  { %p1306_p1 = pnand %p1305_p0, %p1299_p11 }
  0x2d   :  { %1309 = shalt.err (!%p1306_p1)
}
  0x2e   :  { %79 = dma.hbm_to_vmem [thread:$0]  %s1816_s7, 512, %s1506_s27, [#allocation9], %s1408_s22, %s1408_s22, %s1409_s23  }
  0x2f   :  { %s1410_s24 = smov [#allocation2]   ;;  %s1411_s28 = smov [#allocation7]  }
  0x30   :  { %s31_s26 = sshll.u32 %s1410_s24, 4  ;;  %s64_s29 = sshll.u32 %s1411_s28, 4  ;;  %s32_s26 = int_to_ptr.vmem [resolvable:$true] %s31_s26  ;;  %s65_s29 = int_to_ptr.vmem [resolvable:$true] %s64_s29 }
  0x31   :  { %s1835_s19 = sld [smem:[#allocation16_spill]] }
  0x37   :  { %s1310_s1 = scalar_lea.hbm %s1835_s19, 128 }
  0x38   :  { %p1311_p2 = scmp.ne.s32.totalorder %s1835_s19, %s1310_s1  ;;  %p1314_p3 = scmp.lt.u32.totalorder %s1310_s1, %s1835_s19 }
  0x3a   :  { %p1316_p4 = pnand %p1314_p3, %p1311_p2 }
  0x3c   :  { %1319 = shalt.err (!%p1316_p4)
}
  0x3d   :  { %s1320_s7 = scalar_lea.vmem %s32_s26, 128  ;;  %p1325_p6 = scmp.lt.s32.totalorder %s32_s26, %s32_s26 }
  0x3e   :  { %p1321_p5 = scmp.ne.s32.totalorder %s32_s26, %s1320_s7  ;;  %p1326_p7 = scmp.lt.s32.totalorder %s1320_s7, %s1320_s7 }
  0x40   :  { %p1327_p8 = por %p1326_p7, %p1325_p6 }
  0x42   :  { %p1328_p9 = pnand %p1327_p8, %p1321_p5 }
  0x44   :  { %1331 = shalt.err (!%p1328_p9)
}
  0x45   :  { %37 = dma.hbm_to_vmem [thread:$0]  %s1835_s19, 128, %s32_s26, [#allocation3], %s1408_s22, %s1408_s22, %s1409_s23  }
  0x46   :  { %s1332_s16 = scalar_lea.hbm %s1815_s6, 16 }
  0x47   :  { %p1333_p10 = scmp.ne.s32.totalorder %s1815_s6, %s1332_s16  ;;  %p1336_p11 = scmp.lt.u32.totalorder %s1332_s16, %s1815_s6 }
  0x49   :  { %p1338_p12 = pnand %p1336_p11, %p1333_p10 }
  0x4b   :  { %1341 = shalt.err (!%p1338_p12)
}
  0x4c   :  { %s1342_s1 = scalar_lea.vmem %s65_s29, 16  ;;  %s1346_s20 = scalar_lea.vmem %s65_s29, 32 }
  0x4d   :  { %p1343_p13 = scmp.ne.s32.totalorder %s65_s29, %s1342_s1  ;;  %p1347_p0 = scmp.lt.s32.totalorder %s65_s29, %s65_s29 }
  0x4e   :  { %p1348_p1 = scmp.lt.s32.totalorder %s1346_s20, %s1342_s1 }
  0x50   :  { %p1349_p2 = por %p1348_p1, %p1347_p0 }
  0x52   :  { %p1350_p3 = pnand %p1349_p2, %p1343_p13 }
  0x54   :  { %1353 = shalt.err (!%p1350_p3)
}
  0x55   :  { %67 = dma.hbm_to_vmem [thread:$0]  %s1815_s6, 16, %s65_s29, [#allocation6]  }
  0x56   :  { %s1412_s21 = smov [#allocation10]   ;;  %s1354_s0 = scalar_lea.hbm %s1817_s8, 16 }
  0x57   :  { %s86_s7 = sshll.u32 %s1412_s21, 4  ;;  %p1355_p4 = scmp.ne.s32.totalorder %s1817_s8, %s1354_s0  ;;  %s87_s7 = int_to_ptr.vmem [resolvable:$true] %s86_s7 }
  0x58   :  { %p1358_p5 = scmp.lt.u32.totalorder %s1354_s0, %s1817_s8 }
  0x5a   :  { %p1360_p6 = pnand %p1358_p5, %p1355_p4 }
  0x5c   :  { %1363 = shalt.err (!%p1360_p6)
}
  0x5d   :  { %s1364_s30 = scalar_lea.vmem %s87_s7, 16  ;;  %s1368_s6 = scalar_lea.vmem %s87_s7, 32 }
  0x5e   :  { %p1365_p7 = scmp.ne.s32.totalorder %s87_s7, %s1364_s30  ;;  %p1369_p8 = scmp.lt.s32.totalorder %s87_s7, %s87_s7 }
  0x5f   :  { %p1370_p9 = scmp.lt.s32.totalorder %s1368_s6, %s1364_s30 }
  0x61   :  { %p1371_p10 = por %p1370_p9, %p1369_p8 }
  0x63   :  { %p1372_p11 = pnand %p1371_p10, %p1365_p7 }
  0x65   :  { %1375 = shalt.err (!%p1372_p11)
}
  0x66   :  { %89 = dma.hbm_to_vmem [thread:$0]  %s1817_s8, 16, %s87_s7, [#allocation9]  }
  0x67   :  { %1398 = dma.done.wait [#allocation3], 128  }
  0x68   :  { %1399 = vsyncadd [#allocation3], 4294967168 }
  0x69   :  { %1400 = dma.done.wait [#allocation6], 400  }
  0x6a   :  { %1401 = vsyncadd [#allocation6], 4294966896 }
  0x6b   :  { %1402 = dma.done.wait [#allocation9], 528  }
  0x6c   :  { %1403 = vsyncadd [#allocation9], 4294966768  ;;  %v1413_v0 = vmov 0.0   ;;  %vm1414_vm0 = vmmov 0   ;;  %v1218_v1 = vld [vmem:[#allocation5] sm:$0xff]   ;;  %v1219_v2 = vld [vmem:[#allocation5 + $0x8] sm:$0xff]  }
  0x6d   :  { %1082 = vmatprep.subr.bf16.mxu0 %v1413_v0  ;;  %1088 = vmatprep.mubr.msk.bf16.mxu0 %vm1414_vm0, %v1413_v0  ;;  %v1220_v3 = vld [vmem:[#allocation5 + $0x10] sm:$0x3f]   ;;  %vm163_vm1 = vcmask 1045504   ;;  %v1222_v4 = vld [vmem:[%s1812_s3] sm:$0xff]   ;;  %v1223_v5 = vld [vmem:[%s1812_s3 + $0x8] sm:$0xff]   ;;  %vm159_vm2 = vcmask 359424  }
  0x6e   :  { %1092 = vmatprep.subr.bf16.mxu1 %v1413_v0  ;;  %1108 = vmatprep.mubr.msk.bf16.mxu1 %vm1414_vm0, %v1413_v0  ;;  %v165_v6 = vsel %vm163_vm1, %v1220_v3, 0  ;;  %v1221_v7 = vld [vmem:[#allocation2] sm:$0xff]   ;;  %v1224_v8 = vld [vmem:[%s1812_s3 + $0x10] sm:$0xff]   ;;  %v1225_v9 = vld [vmem:[%s1812_s3 + $0x18] sm:$0xff]   ;;  %vm365_vm3 = vcmask 523264   ;;  %s1836_s8 = sld [smem:[#allocation18_spill]] }
  0x6f   :  { %1083 = vmatpush3.bf16.msra.mxu0 %v1218_v1  ;;  %1093 = vmatpush3.bf16.msra.mxu1 %v1222_v4  ;;  %v1226_v10 = vld [vmem:[%s1812_s3 + $0x20] sm:$0xff]   ;;  %v1227_v11 = vld [vmem:[%s1812_s3 + $0x28] sm:$0xff]   ;;  %v1228_v12 = vld [vmem:[%s1812_s3 + $0x30] sm:$0xff]  }
  0x70   :  { %1084 = vmatprep.subr.bf16.mxu0 %v1413_v0  ;;  %1094 = vmatprep.subr.bf16.mxu1 %v1413_v0  ;;  %v1229_v13 = vld [vmem:[%s1812_s3 + $0x38] sm:$0xff]   ;;  %v1230_v14 = vld [vmem:[%s1814_s5] sm:$0xff]   ;;  %v1231_v15 = vld [vmem:[%s1814_s5 + $0x8] sm:$0xff]  }
  0x71   :  { %v958_v16 = vld [vmem:[%s1811_s2] ss:$0 sm:$0xff]  ;;  %v1232_v26 = vld [vmem:[%s1814_s5 + $0x10] sm:$0xff]   ;;  %v1233_v27 = vld [vmem:[%s1814_s5 + $0x18] sm:$0xff]  }
  0x72   :  { %v964_v28 = vld [vmem:[%s1813_s4] ss:$0 sm:$0xff]  ;;  %v1234_v37 = vld [vmem:[#allocation8] sm:$0xff]   ;;  %v1235_v39 = vld [vmem:[#allocation8 + $0x8] sm:$0xff]  }
  0x73   :  { %1085 = vmatpush3.bf16.msra.mxu0 %v1219_v2  ;;  %1095 = vmatpush3.bf16.msra.mxu1 %v1223_v5  ;;  %v1236_v40 = vld [vmem:[#allocation8 + $0x10] sm:$0xff]   ;;  %v1237_v41 = vld [vmem:[#allocation8 + $0x18] sm:$0xff]   ;;  %v1239_v43 = vld [vmem:[%s1818_s9 + $0x8] sm:$0xff]  }
  0x74   :  { %1086 = vmatprep.subr.bf16.mxu0 %v1413_v0  ;;  %1096 = vmatprep.subr.bf16.mxu1 %v1413_v0  ;;  %v1238_v42 = vld [vmem:[%s1818_s9] sm:$0xff]   ;;  %v1240_v44 = vld [vmem:[%s1818_s9 + $0x10] sm:$0xff]   ;;  %v1241_v45 = vld [vmem:[%s1818_s9 + $0x18] sm:$0xff]  }
  0x75   :  { %v1242_v46 = vld [vmem:[%s1818_s9 + $0x20] sm:$0xff]   ;;  %v1243_v47 = vld [vmem:[%s1818_s9 + $0x28] sm:$0xff]   ;;  %v1244_v58 = vld [vmem:[%s1818_s9 + $0x30] sm:$0xff]  }
  0x76   :  { %v973_v48 = vld [vmem:[#allocation7] ss:$0 sm:$0xff]  ;;  %v1245_v59 = vld [vmem:[%s1818_s9 + $0x38] sm:$0xff]   ;;  %v1247_v61 = vld [vmem:[%s1820_s11 + $0x8] sm:$0xff]  }
  0x77   :  { %1087 = vmatpush3.bf16.msra.mxu0 %v165_v6  ;;  %1097 = vmatpush3.bf16.msra.mxu1 %v1224_v8  ;;  %v1246_v60 = vld [vmem:[%s1820_s11] sm:$0xff]   ;;  %v1249_v8 = vld [vmem:[%s1820_s11 + $0x18] sm:$0xff]  }
  0x78   :  { %1112 = vmatprep.subr.bf16.mxu0 %v1413_v0  ;;  %1098 = vmatprep.subr.bf16.mxu1 %v1413_v0  ;;  %v979_v62 = vld [vmem:[#allocation10] ss:$0 sm:$0xff] }
  0x7a   :  { %1089 = vmatmul.mubr.msk.bf16.vlgmr.msra.gmra.mrb[0].mxu0 %vm159_vm2, %v1221_v7  ;;  %v1248_v7 = vld [vmem:[%s1820_s11 + $0x10] sm:$0xff]  }
  0x7b   :  { %1120 = vmatprep.mubr.msk.bf16.mxu0 %vm1414_vm0, %v1413_v0  ;;  %1099 = vmatpush3.bf16.msra.mxu1 %v1225_v9  ;;  %v985_v9 = vld [vmem:[%s1819_s10] ss:$0 sm:$0xff] }
  0x7c   :  { %1100 = vmatprep.subr.bf16.mxu1 %v1413_v0  ;;  %1113 = vmatpush3.bf16.msra.mxu0 %v1230_v14 }
  0x7d   :  { %1114 = vmatprep.subr.bf16.mxu0 %v1413_v0 }
  0x7f   :  { %1101 = vmatpush3.bf16.msra.mxu1 %v1226_v10 }
  0x80   :  { %1102 = vmatprep.subr.bf16.mxu1 %v1413_v0  ;;  %1115 = vmatpush3.bf16.msra.mxu0 %v1231_v15 }
  0x81   :  { %1116 = vmatprep.subr.bf16.mxu0 %v1413_v0 }
  0x83   :  { %1103 = vmatpush3.bf16.msra.mxu1 %v1227_v11 }
  0x84   :  { %1104 = vmatprep.subr.bf16.mxu1 %v1413_v0  ;;  %1117 = vmatpush3.bf16.msra.mxu0 %v1232_v26  ;;  %v1257_v26 = vld [vmem:[%s1822_s13 + $0x38] sm:$0xff]  }
  0x85   :  { %1118 = vmatprep.subr.bf16.mxu0 %v1413_v0 }
  0x87   :  { %1105 = vmatpush3.bf16.msra.mxu1 %v1228_v12 }
  0x88   :  { %1106 = vmatprep.subr.bf16.mxu1 %v1413_v0  ;;  %1119 = vmatpush3.bf16.msra.mxu0 %v1233_v27  ;;  %v1258_v27 = vld [vmem:[%s1824_s15] sm:$0xff]  }
  0x89   :  { %1124 = vmatprep.subr.bf16.mxu0 %v1413_v0 }
  0x8b   :  { %1107 = vmatpush3.bf16.msra.mxu1 %v1229_v13 }
  0x8c   :  { %1136 = vmatprep.subr.bf16.mxu1 %v1413_v0 }
 0x14d   :  { %v201_v17 = vpop.f32.mrb[0].mxu0 }
 0x14e   :  { %v202_v18 = vadd.f32 %v958_v16, %v201_v17  ;;  %v1090_v19 = vpop.f32.mrb[1].mxu0 }
 0x14f   :  { %v204_v20 = vpop.f32.mrb[2].mxu0 }
 0x150   :  { %v205_v21 = vadd.f32 %v958_v16, %v204_v20  ;;  %v1091_v22 = vpop.f32.mrb[3].mxu0  ;;  %v208_v23 = vmax.f32 %v202_v18, 0.0  ;;  %v1250_v18 = vld [vmem:[%s1822_s13] sm:$0xff]   ;;  %v1251_v20 = vld [vmem:[%s1822_s13 + $0x8] sm:$0xff]  }
 0x151   :  { %v1253_v22 = vld [vmem:[%s1822_s13 + $0x18] sm:$0xff]  }
 0x152   :  { %v209_v24 = vmax.f32 %v205_v21, 0.0  ;;  %v1252_v21 = vld [vmem:[%s1822_s13 + $0x10] sm:$0xff]  }
 0x154   :  { %v210_v25 = vpack.c.bf16 %v209_v24, %v208_v23  ;;  %v1254_v23 = vld [vmem:[%s1822_s13 + $0x20] sm:$0xff]   ;;  %v1255_v24 = vld [vmem:[%s1822_s13 + $0x28] sm:$0xff]  }
 0x156   :  { %1109 = vmatmul.mubr.bf16.vlgmr.msra.gmra.mrb[0].mxu1 %v210_v25  ;;  %v1256_v25 = vld [vmem:[%s1822_s13 + $0x30] sm:$0xff]  }
 0x157   :  { %1152 = vmatprep.mubr.msk.bf16.mxu1 %vm1414_vm0, %v1413_v0  ;;  %1137 = vmatpush3.bf16.msra.mxu1 %v1238_v42 }
 0x158   :  { %1138 = vmatprep.subr.bf16.mxu1 %v1413_v0 }
 0x15b   :  { %1139 = vmatpush3.bf16.msra.mxu1 %v1239_v43  ;;  %v1264_v43 = vld [vmem:[%s1824_s15 + $0x30] sm:$0xff]  }
 0x15c   :  { %1140 = vmatprep.subr.bf16.mxu1 %v1413_v0 }
 0x15f   :  { %1141 = vmatpush3.bf16.msra.mxu1 %v1240_v44  ;;  %v1265_v44 = vld [vmem:[%s1824_s15 + $0x38] sm:$0xff]  }
 0x160   :  { %1142 = vmatprep.subr.bf16.mxu1 %v1413_v0 }
 0x163   :  { %1143 = vmatpush3.bf16.msra.mxu1 %v1241_v45  ;;  %v1000_v45 = vld [vmem:[%s1823_s14] ss:$0 sm:$0xff]  ;;  %s1415_s14 = smov [#allocation11]  }
 0x164   :  { %1144 = vmatprep.subr.bf16.mxu1 %v1413_v0 }
 0x167   :  { %1145 = vmatpush3.bf16.msra.mxu1 %v1242_v46 }
 0x168   :  { %1146 = vmatprep.subr.bf16.mxu1 %v1413_v0 }
 0x16b   :  { %1147 = vmatpush3.bf16.msra.mxu1 %v1243_v47 }
 0x16c   :  { %1148 = vmatprep.subr.bf16.mxu1 %v1413_v0 }
 0x16f   :  { %1149 = vmatpush3.bf16.msra.mxu1 %v1244_v58 }
 0x170   :  { %1150 = vmatprep.subr.bf16.mxu1 %v1413_v0 }
 0x173   :  { %1151 = vmatpush3.bf16.msra.mxu1 %v1245_v59 }
 0x174   :  { %1188 = vmatprep.subr.bf16.mxu1 %v1413_v0 }
 0x229   :  { %v316_v29 = vpop.f32.mrb[0].mxu1 }
 0x22a   :  { %v317_v30 = vadd.f32 %v964_v28, %v316_v29  ;;  %v1110_v31 = vpop.f32.mrb[1].mxu1  ;;  %v1260_v29 = vld [vmem:[%s1824_s15 + $0x10] sm:$0xff]  }
 0x22b   :  { %v319_v32 = vpop.f32.mrb[2].mxu1  ;;  %v1262_v31 = vld [vmem:[%s1824_s15 + $0x20] sm:$0xff]  }
 0x22c   :  { %v320_v33 = vadd.f32 %v964_v28, %v319_v32  ;;  %v1111_v34 = vpop.f32.mrb[3].mxu1  ;;  %v323_v35 = vmax.f32 %v317_v30, 0.0  ;;  %v1259_v28 = vld [vmem:[%s1824_s15 + $0x8] sm:$0xff]   ;;  %v1261_v30 = vld [vmem:[%s1824_s15 + $0x18] sm:$0xff]  }
 0x22d   :  { %v1263_v32 = vld [vmem:[%s1824_s15 + $0x28] sm:$0xff]   ;;  %s944_s15 = sshll.u32 %s1415_s14, 4  ;;  %s945_s15 = int_to_ptr.vmem [resolvable:$true] %s944_s15 }
 0x22e   :  { %v324_v36 = vmax.f32 %v320_v33, 0.0  ;;  %v994_v33 = vld [vmem:[%s1821_s12] ss:$0 sm:$0xff]  ;;  %s1376_s1 = scalar_lea.vmem %s945_s15, 128  ;;  %p1381_p13 = scmp.lt.s32.totalorder %s945_s15, %s945_s15 }
 0x22f   :  { %p1377_p12 = scmp.ne.s32.totalorder %s945_s15, %s1376_s1  ;;  %p1382_p0 = scmp.lt.s32.totalorder %s1376_s1, %s1376_s1 }
 0x230   :  { %v325_v38 = vpack.c.bf16 %v324_v36, %v323_v35 }
 0x231   :  { %p1383_p1 = por %p1382_p0, %p1381_p13 }
 0x232   :  { %1121 = vmatmul.mubr.msk.bf16.vlgmr.msra.gmra.mrb[4].mxu0 %vm365_vm3, %v325_v38 }
 0x233   :  { %1125 = vmatpush3.bf16.msra.mxu0 %v1234_v37  ;;  %1132 = vmatprep.mubr.msk.bf16.mxu0 %vm1414_vm0, %v1413_v0  ;;  %p1384_p2 = pnand %p1383_p1, %p1377_p12 }
 0x234   :  { %1126 = vmatprep.subr.bf16.mxu0 %v1413_v0 }
 0x237   :  { %1127 = vmatpush3.bf16.msra.mxu0 %v1235_v39 }
 0x238   :  { %1128 = vmatprep.subr.bf16.mxu0 %v1413_v0 }
 0x23b   :  { %1129 = vmatpush3.bf16.msra.mxu0 %v1236_v40 }
 0x23c   :  { %1130 = vmatprep.subr.bf16.mxu0 %v1413_v0 }
 0x23f   :  { %1131 = vmatpush3.bf16.msra.mxu0 %v1237_v41 }
 0x240   :  { %1156 = vmatprep.subr.bf16.mxu0 %v1413_v0 }
 0x305   :  { %v403_v49 = vpop.f32.mrb[4].mxu0 }
 0x306   :  { %v404_v50 = vadd.f32 %v973_v48, %v403_v49  ;;  %v1122_v51 = vpop.f32.mrb[5].mxu0 }
 0x307   :  { %v406_v52 = vpop.f32.mrb[6].mxu0 }
 0x308   :  { %v407_v53 = vadd.f32 %v973_v48, %v406_v52  ;;  %v1123_v54 = vpop.f32.mrb[7].mxu0  ;;  %v410_v55 = vmax.f32 %v404_v50, 0.0 }
 0x30a   :  { %v411_v56 = vmax.f32 %v407_v53, 0.0 }
 0x30c   :  { %v412_v57 = vpack.c.bf16 %v411_v56, %v410_v55 }
 0x30e   :  { %1133 = vmatmul.mubr.msk.bf16.vlgmr.msra.gmra.mrb[8].mxu0 %vm365_vm3, %v412_v57 }
 0x30f   :  { %1164 = vmatprep.mubr.msk.bf16.mxu0 %vm1414_vm0, %v1413_v0  ;;  %1157 = vmatpush3.bf16.msra.mxu0 %v1246_v60 }
 0x310   :  { %1158 = vmatprep.subr.bf16.mxu0 %v1413_v0 }
 0x313   :  { %1159 = vmatpush3.bf16.msra.mxu0 %v1247_v61 }
 0x314   :  { %1160 = vmatprep.subr.bf16.mxu0 %v1413_v0 }
 0x317   :  { %1161 = vmatpush3.bf16.msra.mxu0 %v1248_v7 }
 0x318   :  { %1162 = vmatprep.subr.bf16.mxu0 %v1413_v0 }
 0x31b   :  { %1163 = vmatpush3.bf16.msra.mxu0 %v1249_v8 }
 0x31c   :  { %1168 = vmatprep.subr.bf16.mxu0 %v1413_v0 }
 0x3e1   :  { %v489_v63 = vpop.f32.mrb[8].mxu0 }
 0x3e2   :  { %v1134_v1 = vpop.f32.mrb[9].mxu0  ;;  %v1699_v3 = vadd.f32 %v979_v62, %v489_v63 }
 0x3e3   :  { %v492_v2 = vpop.f32.mrb[10].mxu0 }
 0x3e4   :  { %v1701_v4 = vadd.f32 %v979_v62, %v492_v2  ;;  %v1135_v5 = vpop.f32.mrb[11].mxu0 }
 0x3e6   :  { %v496_v6 = vpack.c.bf16 %v1701_v4, %v1699_v3 }
 0x3e8   :  { %1153 = vmatmul.mubr.bf16.vlgmr.msra.gmra.mrb[4].mxu1 %v496_v6 }
 0x3e9   :  { %1204 = vmatprep.mubr.msk.bf16.mxu1 %vm1414_vm0, %v1413_v0  ;;  %1189 = vmatpush3.bf16.msra.mxu1 %v1258_v27 }
 0x3ea   :  { %1190 = vmatprep.subr.bf16.mxu1 %v1413_v0 }
 0x3ed   :  { %1191 = vmatpush3.bf16.msra.mxu1 %v1259_v28 }
 0x3ee   :  { %1192 = vmatprep.subr.bf16.mxu1 %v1413_v0 }
 0x3f1   :  { %1193 = vmatpush3.bf16.msra.mxu1 %v1260_v29 }
 0x3f2   :  { %1194 = vmatprep.subr.bf16.mxu1 %v1413_v0 }
 0x3f5   :  { %1195 = vmatpush3.bf16.msra.mxu1 %v1261_v30 }
 0x3f6   :  { %1196 = vmatprep.subr.bf16.mxu1 %v1413_v0 }
 0x3f9   :  { %1197 = vmatpush3.bf16.msra.mxu1 %v1262_v31 }
 0x3fa   :  { %1198 = vmatprep.subr.bf16.mxu1 %v1413_v0 }
 0x3fd   :  { %1199 = vmatpush3.bf16.msra.mxu1 %v1263_v32 }
 0x3fe   :  { %1200 = vmatprep.subr.bf16.mxu1 %v1413_v0 }
 0x401   :  { %1201 = vmatpush3.bf16.msra.mxu1 %v1264_v43 }
 0x402   :  { %1202 = vmatprep.subr.bf16.mxu1 %v1413_v0 }
 0x405   :  { %1203 = vmatpush3.bf16.msra.mxu1 %v1265_v44 }
 0x4bb   :  { %v602_v10 = vpop.f32.mrb[4].mxu1 }
 0x4bc   :  { %v603_v11 = vadd.f32 %v985_v9, %v602_v10  ;;  %v1154_v12 = vpop.f32.mrb[5].mxu1 }
 0x4bd   :  { %v605_v13 = vpop.f32.mrb[6].mxu1 }
 0x4be   :  { %v606_v14 = vadd.f32 %v985_v9, %v605_v13  ;;  %v1155_v15 = vpop.f32.mrb[7].mxu1  ;;  %v609_v16 = vmax.f32 %v603_v11, 0.0 }
 0x4c0   :  { %v610_v17 = vmax.f32 %v606_v14, 0.0 }
 0x4c2   :  { %v611_v19 = vpack.c.bf16 %v610_v17, %v609_v16 }
 0x4c4   :  { %1165 = vmatmul.mubr.msk.bf16.vlgmr.msra.gmra.mrb[12].mxu0 %vm365_vm3, %v611_v19 }
 0x4c5   :  { %1169 = vmatpush3.bf16.msra.mxu0 %v1250_v18  ;;  %1184 = vmatprep.mubr.msk.bf16.mxu0 %vm1414_vm0, %v1413_v0 }
 0x4c6   :  { %1170 = vmatprep.subr.bf16.mxu0 %v1413_v0 }
 0x4c9   :  { %1171 = vmatpush3.bf16.msra.mxu0 %v1251_v20 }
 0x4ca   :  { %1172 = vmatprep.subr.bf16.mxu0 %v1413_v0 }
 0x4cd   :  { %1173 = vmatpush3.bf16.msra.mxu0 %v1252_v21 }
 0x4ce   :  { %1174 = vmatprep.subr.bf16.mxu0 %v1413_v0 }
 0x4d1   :  { %1175 = vmatpush3.bf16.msra.mxu0 %v1253_v22 }
 0x4d2   :  { %1176 = vmatprep.subr.bf16.mxu0 %v1413_v0 }
 0x4d5   :  { %1177 = vmatpush3.bf16.msra.mxu0 %v1254_v23 }
 0x4d6   :  { %1178 = vmatprep.subr.bf16.mxu0 %v1413_v0 }
 0x4d9   :  { %1179 = vmatpush3.bf16.msra.mxu0 %v1255_v24 }
 0x4da   :  { %1180 = vmatprep.subr.bf16.mxu0 %v1413_v0 }
 0x4dd   :  { %1181 = vmatpush3.bf16.msra.mxu0 %v1256_v25 }
 0x4de   :  { %1182 = vmatprep.subr.bf16.mxu0 %v1413_v0  ;;  %v1009_v0 = vld [vmem:[%s1836_s8] ss:$0 sm:$0xff] }
 0x4e1   :  { %1183 = vmatpush3.bf16.msra.mxu0 %v1257_v26 }
 0x597   :  { %v688_v34 = vpop.f32.mrb[12].mxu0 }
 0x598   :  { %v689_v35 = vadd.f32 %v994_v33, %v688_v34  ;;  %v1166_v36 = vpop.f32.mrb[13].mxu0 }
 0x599   :  { %v691_v37 = vpop.f32.mrb[14].mxu0 }
 0x59a   :  { %v692_v38 = vadd.f32 %v994_v33, %v691_v37  ;;  %v1167_v39 = vpop.f32.mrb[15].mxu0  ;;  %v695_v40 = vmax.f32 %v689_v35, 0.0 }
 0x59c   :  { %v696_v41 = vmax.f32 %v692_v38, 0.0 }
 0x59e   :  { %v697_v42 = vpack.c.bf16 %v696_v41, %v695_v40 }
 0x5a0   :  { %1185 = vmatmul.mubr.bf16.vlgmr.msra.gmra.mrb[16].mxu0 %v697_v42 }
 0x673   :  { %v803_v46 = vpop.f32.mrb[16].mxu0 }
 0x674   :  { %v804_v47 = vadd.f32 %v1000_v45, %v803_v46  ;;  %v1186_v48 = vpop.f32.mrb[17].mxu0 }
 0x675   :  { %v806_v49 = vpop.f32.mrb[18].mxu0 }
 0x676   :  { %v807_v50 = vadd.f32 %v1000_v45, %v806_v49  ;;  %v1187_v51 = vpop.f32.mrb[19].mxu0  ;;  %v810_v52 = vmax.f32 %v804_v47, 0.0 }
 0x678   :  { %v811_v53 = vmax.f32 %v807_v50, 0.0 }
 0x67a   :  { %v812_v54 = vpack.c.bf16 %v811_v53, %v810_v52 }
 0x67c   :  { %1205 = vmatmul.mubr.bf16.vlgmr.msra.gmra.mrb[8].mxu1 %v812_v54 }
 0x74f   :  { %v918_v55 = vpop.f32.mrb[8].mxu1 }
 0x750   :  { %v919_v56 = vadd.f32 %v1009_v0, %v918_v55  ;;  %v1206_v57 = vpop.f32.mrb[9].mxu1 }
 0x751   :  { %v921_v58 = vpop.f32.mrb[10].mxu1 }
 0x752   :  { %v925_v59 = vmax.f32 %v919_v56, 0.0  ;;  %v922_v60 = vadd.f32 %v1009_v0, %v921_v58  ;;  %v1207_v61 = vpop.f32.mrb[11].mxu1 }
 0x754   :  { %v926_v62 = vmax.f32 %v922_v60, 0.0  ;;  %v927_v63 = vadd.f32 %v925_v59, %v1699_v3 }
 0x756   :  { %v928_v1 = vadd.f32 %v926_v62, %v1701_v4 }
 0x758   :  { %v1025_v2 = vpack.c.bf16 %v928_v1, %v927_v63 }
 0x75a   :  { %1026 = vst [vmem:[#allocation11] sm:$0xff] %v1025_v2  }
 0x75b   :  { %1387 = shalt.err (!%p1384_p2)
}
 0x75c   :  { %s1837_s3 = sld [smem:[#allocation19_spill]] }
 0x762   :  { %s1388_s19 = scalar_lea.hbm %s1837_s3, 128 }
 0x763   :  { %p1389_p3 = scmp.ne.s32.totalorder %s1837_s3, %s1388_s19  ;;  %p1392_p4 = scmp.lt.u32.totalorder %s1388_s19, %s1837_s3 }
 0x765   :  { %p1394_p5 = pnand %p1392_p4, %p1389_p3 }
 0x767   :  { %1397 = shalt.err (!%p1394_p5)
}
 0x768   :  { %950 = dma.vmem_to_hbm [thread:$0]  %s945_s15, 128, %s1837_s3, [#allocation4], %s1408_s22, %s1408_s22, %s1409_s23  }
 0x769   :  { %1404 = dma.done.wait [#allocation4], 128  }
 0x76a   :  { %1405 = vsyncadd [#allocation4], 4294967168 }
 0x76b   :  { %954 = vsyncpa [#allocation3], 1 }
 0x76c   :  { %955 = vsyncpa [#allocation6], 1 }
 0x76d   :  { %956 = vsyncpa [#allocation9], 1 }
 0x76e   :  { %957 = vsyncpa [#allocation4], 1 }

</bundles_post_ra>
